<compile_context>
chip_gen: v5e
topology: v5e:2x2
jax: 0.10.0
libtpu: 0.0.40
codegen_flags: <defaults>
</compile_context>

<pallas_src>
import math
import jax
import jax.numpy as jnp
from jax.experimental import pallas as pl
from jax.experimental.pallas import tpu as pltpu


HIDDEN = (400, 300, 100)        # original nn.Linear widths
HIDDEN_PAD = (512, 384, 128)    # lane-aligned (multiples of 128)
OUT_PAD = 128                   # lane-dense output block width (col 0 = q)


def _round_up(x, m):
    return ((x + m - 1) // m) * m


def critic_state_kernel(x_ref, u_ref,
                        w1s_ref, w1a_ref, b1_ref,
                        w2_ref, b2_ref,
                        w3_ref, b3_ref,
                        w4_ref, b4_ref,
                        o_ref):
    """One batch tile of the MLP: 4 (zero-padded) MXU matmuls, bias + ReLU.

    Weights are bf16 (MXU native); accumulation is f32; activations are cast
    back to bf16 between layers. Zero-padded rows/cols make the padded math
    identical to the unpadded reference.
    """
    x = x_ref[...].astype(jnp.bfloat16)
    u = u_ref[...].astype(jnp.bfloat16)

    h = (jnp.dot(x, w1s_ref[...], preferred_element_type=jnp.float32)
         + jnp.dot(u, w1a_ref[...], preferred_element_type=jnp.float32)
         + b1_ref[...])
    h = jnp.maximum(h, 0.0).astype(jnp.bfloat16)

    h = jnp.dot(h, w2_ref[...], preferred_element_type=jnp.float32) + b2_ref[...]
    h = jnp.maximum(h, 0.0).astype(jnp.bfloat16)

    h = jnp.dot(h, w3_ref[...], preferred_element_type=jnp.float32) + b3_ref[...]
    h = jnp.maximum(h, 0.0).astype(jnp.bfloat16)

    q = jnp.dot(h, w4_ref[...], preferred_element_type=jnp.float32) + b4_ref[...]
    o_ref[...] = q.astype(o_ref.dtype)   # lane-dense (TILE_B, 128) store


def init_params(key, state_dim, action_dim):
    """nn.Linear default init: U(-1/sqrt(fan_in), 1/sqrt(fan_in)).
    Returns the *original* (unpadded, f32) parameter shapes."""
    dims = [(state_dim + action_dim, HIDDEN[0]),
            (HIDDEN[0], HIDDEN[1]),
            (HIDDEN[1], HIDDEN[2]),
            (HIDDEN[2], 1)]
    params = []
    for fan_in, fan_out in dims:
        key, kw, kb = jax.random.split(key, 3)
        bound = 1.0 / math.sqrt(fan_in)
        w = jax.random.uniform(kw, (fan_in, fan_out), jnp.float32, -bound, bound)
        b = jax.random.uniform(kb, (1, fan_out), jnp.float32, -bound, bound)
        params.append((w, b))
    return params


def prepare_kernel_params(params, state_dim):
    """Split W1 into state/action parts, zero-pad to lane-aligned widths,
    cast weights to bf16 (biases stay f32 for the accumulate-add)."""
    (w1, b1), (w2, b2), (w3, b3), (w4, b4) = params
    H1, H2, H3 = HIDDEN_PAD

    def pad2(a, rows, cols):
        r, c = a.shape
        return jnp.pad(a, ((0, rows - r), (0, cols - c)))

    w1s = pad2(w1[:state_dim], state_dim, H1).astype(jnp.bfloat16)
    w1a = pad2(w1[state_dim:], w1.shape[0] - state_dim, H1).astype(jnp.bfloat16)
    b1p = pad2(b1, 1, H1)
    w2p = pad2(w2, H1, H2).astype(jnp.bfloat16)
    b2p = pad2(b2, 1, H2)
    w3p = pad2(w3, H2, H3).astype(jnp.bfloat16)
    b3p = pad2(b3, 1, H3)
    w4p = pad2(w4, H3, OUT_PAD).astype(jnp.bfloat16)
    b4p = pad2(b4, 1, OUT_PAD)
    return (w1s, w1a, b1p, w2p, b2p, w3p, b3p, w4p, b4p)


def critic_state_forward(x, u, kernel_params, *, tile_b_max=256):
    """x: (B, state_dim), u: (B, action_dim). Returns (B, 1) Q-values."""
    B, sd = x.shape
    _, ad = u.shape
    H1, H2, H3 = HIDDEN_PAD

    # Batch tiling: tile_b rows per grid step (sublane-aligned, zero-padded).
    if B <= tile_b_max:
        tile_b = _round_up(B, 8)
        b_pad = tile_b
    else:
        tile_b = tile_b_max
        b_pad = _round_up(B, tile_b)
    if b_pad != B:
        x = jnp.pad(x, ((0, b_pad - B), (0, 0)))
        u = jnp.pad(u, ((0, b_pad - B), (0, 0)))

    w1s, w1a, b1, w2, b2, w3, b3, w4, b4 = kernel_params
    weights = (w1s, w1a, b1, w2, b2, w3, b3, w4, b4)

    const_map = lambda i: (0, 0)   # weights/biases resident across the grid
    in_specs = [
        pl.BlockSpec((tile_b, sd), lambda i: (i, 0)),
        pl.BlockSpec((tile_b, ad), lambda i: (i, 0)),
    ] + [pl.BlockSpec(w.shape, const_map) for w in weights]
    out_specs = pl.BlockSpec((tile_b, OUT_PAD), lambda i: (i, 0))

    flops = 2 * b_pad * (sd * H1 + ad * H1 + H1 * H2 + H2 * H3 + H3 * OUT_PAD)
    bytes_accessed = (sum(w.size * w.dtype.itemsize for w in weights)
                      + x.size * x.dtype.itemsize
                      + u.size * u.dtype.itemsize
                      + b_pad * OUT_PAD * 4)

    q_pad = pl.pallas_call(
        critic_state_kernel,
        out_shape=jax.ShapeDtypeStruct((b_pad, OUT_PAD), jnp.float32),
        grid=(b_pad // tile_b,),
        in_specs=in_specs,
        out_specs=out_specs,
        compiler_params=pltpu.CompilerParams(
            dimension_semantics=("parallel",),   # v7x: split batch across TCs
            vmem_limit_bytes=16 * 1024 * 1024,
        ),
        cost_estimate=pl.CostEstimate(
            flops=flops, transcendentals=0, bytes_accessed=bytes_accessed),
    )(x, u, *weights)

    return q_pad[:B, :1]   # lane-dense block -> (B, 1); slice is free plumbing


if __name__ == "__main__":
    state_dim, action_dim, batch = 16, 8, 2

    key = jax.random.PRNGKey(0)
    kx, ku, kp = jax.random.split(key, 3)
    x = jax.random.normal(kx, (batch, state_dim), jnp.float32)
    u = jax.random.normal(ku, (batch, action_dim), jnp.float32)
    params = init_params(kp, state_dim, action_dim)
    kparams = prepare_kernel_params(params, state_dim)

    q = critic_state_forward(x, u, kparams)
    jax.block_until_ready(q)
    assert q.shape == (batch, 1)

    # Reference 1: module semantics in f32 (loose tol — kernel uses bf16 weights).
    xu = jnp.concatenate([x, u], axis=1)
    (w1, b1), (w2, b2), (w3, b3), (w4, b4) = params
    r = jnp.maximum(xu @ w1 + b1, 0.0)
    r = jnp.maximum(r @ w2 + b2, 0.0)
    r = jnp.maximum(r @ w3 + b3, 0.0)
    r = r @ w4 + b4
    assert jnp.allclose(q, r, atol=5e-2, rtol=5e-2), (q, r)

    # Reference 2: pure-JAX mirror of the kernel's bf16/f32 precision (tight tol).
    w1s, w1a, b1p, w2p, b2p, w3p, b3p, w4p, b4p = kparams
    hb = (jnp.dot(x.astype(jnp.bfloat16), w1s, preferred_element_type=jnp.float32)
          + jnp.dot(u.astype(jnp.bfloat16), w1a, preferred_element_type=jnp.float32)
          + b1p)
    hb = jnp.maximum(hb, 0.0).astype(jnp.bfloat16)
    hb = jnp.maximum(jnp.dot(hb, w2p, preferred_element_type=jnp.float32) + b2p,
                     0.0).astype(jnp.bfloat16)
    hb = jnp.maximum(jnp.dot(hb, w3p, preferred_element_type=jnp.float32) + b3p,
                     0.0).astype(jnp.bfloat16)
    qb = (jnp.dot(hb, w4p, preferred_element_type=jnp.float32) + b4p)[:batch, :1]
    assert jnp.allclose(q, qb, atol=1e-3, rtol=1e-3), (q, qb)

    print("KERNEL_OK")
</pallas_src>

<mosaic_0001>
module attributes {stable_mosaic.version = 11 : i64} {
  func.func @critic_state_kernel(%arg0: i32, %arg1: memref<8x16xf32, #tpu.memory_space<vmem>>, %arg2: memref<8x8xf32, #tpu.memory_space<vmem>>, %arg3: memref<16x512xbf16, #tpu.memory_space<vmem>>, %arg4: memref<8x512xbf16, #tpu.memory_space<vmem>>, %arg5: memref<1x512xf32, #tpu.memory_space<vmem>>, %arg6: memref<512x384xbf16, #tpu.memory_space<vmem>>, %arg7: memref<1x384xf32, #tpu.memory_space<vmem>>, %arg8: memref<384x128xbf16, #tpu.memory_space<vmem>>, %arg9: memref<1x128xf32, #tpu.memory_space<vmem>>, %arg10: memref<128x128xbf16, #tpu.memory_space<vmem>>, %arg11: memref<1x128xf32, #tpu.memory_space<vmem>>, %arg12: memref<8x128xf32, #tpu.memory_space<vmem>>) attributes {dimension_semantics = [#tpu.dimension_semantics<parallel>], iteration_bounds = array<i64: 1>, scalar_prefetch = 0 : i64, scratch_operands = 0 : i64, tpu.core_type = #tpu.core_type<tc>, window_params = [{transform_indices = @transform_0, window_bounds = array<i64: 8, 16>}, {transform_indices = @transform_1, window_bounds = array<i64: 8, 8>}, {pipeline_mode = #tpu.pipeline_mode<synchronous>, transform_indices = @transform_2, window_bounds = array<i64: 16, 512>}, {pipeline_mode = #tpu.pipeline_mode<synchronous>, transform_indices = @transform_3, window_bounds = array<i64: 8, 512>}, {pipeline_mode = #tpu.pipeline_mode<synchronous>, transform_indices = @transform_4, window_bounds = array<i64: 1, 512>}, {pipeline_mode = #tpu.pipeline_mode<synchronous>, transform_indices = @transform_5, window_bounds = array<i64: 512, 384>}, {pipeline_mode = #tpu.pipeline_mode<synchronous>, transform_indices = @transform_6, window_bounds = array<i64: 1, 384>}, {pipeline_mode = #tpu.pipeline_mode<synchronous>, transform_indices = @transform_7, window_bounds = array<i64: 384, 128>}, {pipeline_mode = #tpu.pipeline_mode<synchronous>, transform_indices = @transform_8, window_bounds = array<i64: 1, 128>}, {pipeline_mode = #tpu.pipeline_mode<synchronous>, transform_indices = @transform_9, window_bounds = array<i64: 128, 128>}, {pipeline_mode = #tpu.pipeline_mode<synchronous>, transform_indices = @transform_10, window_bounds = array<i64: 1, 128>}, {transform_indices = @transform_11, window_bounds = array<i64: 8, 128>}]} {
    %c0 = arith.constant 0 : index
    %c0_0 = arith.constant 0 : index
    %0 = vector.load %arg1[%c0, %c0_0] : memref<8x16xf32, #tpu.memory_space<vmem>>, vector<8x16xf32>
    %1 = arith.truncf %0 : vector<8x16xf32> to vector<8x16xbf16>
    %c0_1 = arith.constant 0 : index
    %c0_2 = arith.constant 0 : index
    %2 = vector.load %arg2[%c0_1, %c0_2] : memref<8x8xf32, #tpu.memory_space<vmem>>, vector<8x8xf32>
    %3 = arith.truncf %2 : vector<8x8xf32> to vector<8x8xbf16>
    %c0_3 = arith.constant 0 : index
    %c0_4 = arith.constant 0 : index
    %4 = vector.load %arg3[%c0_3, %c0_4] : memref<16x512xbf16, #tpu.memory_space<vmem>>, vector<16x512xbf16>
    %cst = arith.constant dense<0.000000e+00> : vector<8x512xf32>
    %5 = tpu.matmul %1, %4, %cst {dimension_numbers = #tpu.dot_dimension_numbers<[1], [0], [0], [1], [0, 0, 1, 1], [], []>} : vector<8x16xbf16>, vector<16x512xbf16>, vector<8x512xf32> -> vector<8x512xf32>
    %c0_5 = arith.constant 0 : index
    %c0_6 = arith.constant 0 : index
    %6 = vector.load %arg4[%c0_5, %c0_6] : memref<8x512xbf16, #tpu.memory_space<vmem>>, vector<8x512xbf16>
    %cst_7 = arith.constant dense<0.000000e+00> : vector<8x512xf32>
    %7 = tpu.matmul %3, %6, %cst_7 {dimension_numbers = #tpu.dot_dimension_numbers<[1], [0], [0], [1], [0, 0, 1, 1], [], []>} : vector<8x8xbf16>, vector<8x512xbf16>, vector<8x512xf32> -> vector<8x512xf32>
    %8 = arith.addf %5, %7 : vector<8x512xf32>
    %c0_8 = arith.constant 0 : index
    %c0_9 = arith.constant 0 : index
    %9 = vector.load %arg5[%c0_8, %c0_9] : memref<1x512xf32, #tpu.memory_space<vmem>>, vector<1x512xf32>
    %10 = vector.broadcast %9 : vector<1x512xf32> to vector<8x512xf32>
    %11 = arith.addf %8, %10 : vector<8x512xf32>
    %cst_10 = arith.constant 0.000000e+00 : f32
    %12 = vector.broadcast %cst_10 : f32 to vector<8x512xf32>
    %13 = arith.maximumf %11, %12 : vector<8x512xf32>
    %14 = arith.truncf %13 : vector<8x512xf32> to vector<8x512xbf16>
    %c0_11 = arith.constant 0 : index
    %c0_12 = arith.constant 0 : index
    %15 = vector.load %arg6[%c0_11, %c0_12] : memref<512x384xbf16, #tpu.memory_space<vmem>>, vector<512x384xbf16>
    %cst_13 = arith.constant dense<0.000000e+00> : vector<8x384xf32>
    %16 = tpu.matmul %14, %15, %cst_13 {dimension_numbers = #tpu.dot_dimension_numbers<[1], [0], [0], [1], [0, 0, 1, 1], [], []>} : vector<8x512xbf16>, vector<512x384xbf16>, vector<8x384xf32> -> vector<8x384xf32>
    %c0_14 = arith.constant 0 : index
    %c0_15 = arith.constant 0 : index
    %17 = vector.load %arg7[%c0_14, %c0_15] : memref<1x384xf32, #tpu.memory_space<vmem>>, vector<1x384xf32>
    %18 = vector.broadcast %17 : vector<1x384xf32> to vector<8x384xf32>
    %19 = arith.addf %16, %18 : vector<8x384xf32>
    %cst_16 = arith.constant 0.000000e+00 : f32
    %20 = vector.broadcast %cst_16 : f32 to vector<8x384xf32>
    %21 = arith.maximumf %19, %20 : vector<8x384xf32>
    %22 = arith.truncf %21 : vector<8x384xf32> to vector<8x384xbf16>
    %c0_17 = arith.constant 0 : index
    %c0_18 = arith.constant 0 : index
    %23 = vector.load %arg8[%c0_17, %c0_18] : memref<384x128xbf16, #tpu.memory_space<vmem>>, vector<384x128xbf16>
    %cst_19 = arith.constant dense<0.000000e+00> : vector<8x128xf32>
    %24 = tpu.matmul %22, %23, %cst_19 {dimension_numbers = #tpu.dot_dimension_numbers<[1], [0], [0], [1], [0, 0, 1, 1], [], []>} : vector<8x384xbf16>, vector<384x128xbf16>, vector<8x128xf32> -> vector<8x128xf32>
    %c0_20 = arith.constant 0 : index
    %c0_21 = arith.constant 0 : index
    %25 = vector.load %arg9[%c0_20, %c0_21] : memref<1x128xf32, #tpu.memory_space<vmem>>, vector<1x128xf32>
    %26 = vector.broadcast %25 : vector<1x128xf32> to vector<8x128xf32>
    %27 = arith.addf %24, %26 : vector<8x128xf32>
    %cst_22 = arith.constant 0.000000e+00 : f32
    %28 = vector.broadcast %cst_22 : f32 to vector<8x128xf32>
    %29 = arith.maximumf %27, %28 : vector<8x128xf32>
    %30 = arith.truncf %29 : vector<8x128xf32> to vector<8x128xbf16>
    %c0_23 = arith.constant 0 : index
    %c0_24 = arith.constant 0 : index
    %31 = vector.load %arg10[%c0_23, %c0_24] : memref<128x128xbf16, #tpu.memory_space<vmem>>, vector<128x128xbf16>
    %cst_25 = arith.constant dense<0.000000e+00> : vector<8x128xf32>
    %32 = tpu.matmul %30, %31, %cst_25 {dimension_numbers = #tpu.dot_dimension_numbers<[1], [0], [0], [1], [0, 0, 1, 1], [], []>} : vector<8x128xbf16>, vector<128x128xbf16>, vector<8x128xf32> -> vector<8x128xf32>
    %c0_26 = arith.constant 0 : index
    %c0_27 = arith.constant 0 : index
    %33 = vector.load %arg11[%c0_26, %c0_27] : memref<1x128xf32, #tpu.memory_space<vmem>>, vector<1x128xf32>
    %34 = vector.broadcast %33 : vector<1x128xf32> to vector<8x128xf32>
    %35 = arith.addf %32, %34 : vector<8x128xf32>
    %c0_28 = arith.constant 0 : index
    %c0_29 = arith.constant 0 : index
    %36 = vector.load %arg12[%c0_28, %c0_29] : memref<8x128xf32, #tpu.memory_space<vmem>>, vector<8x128xf32>
    tpu.vector_store %arg12[%c0_28, %c0_29], %35 {strides = array<i32>} : memref<8x128xf32, #tpu.memory_space<vmem>>, vector<8x128xf32>,
    return
  }
  func.func @transform_0(%arg0: i32) -> (i32, i32) {
    %c0_i32 = arith.constant 0 : i32
    %c0_i32_0 = arith.constant 0 : i32
    return %arg0, %c0_i32 : i32, i32
  }
  func.func @transform_1(%arg0: i32) -> (i32, i32) {
    %c0_i32 = arith.constant 0 : i32
    %c0_i32_0 = arith.constant 0 : i32
    return %arg0, %c0_i32 : i32, i32
  }
  func.func @transform_2(%arg0: i32) -> (i32, i32) {
    %c0_i32 = arith.constant 0 : i32
    %c0_i32_0 = arith.constant 0 : i32
    %c0_i32_1 = arith.constant 0 : i32
    return %c0_i32, %c0_i32_0 : i32, i32
  }
  func.func @transform_3(%arg0: i32) -> (i32, i32) {
    %c0_i32 = arith.constant 0 : i32
    %c0_i32_0 = arith.constant 0 : i32
    %c0_i32_1 = arith.constant 0 : i32
    return %c0_i32, %c0_i32_0 : i32, i32
  }
  func.func @transform_4(%arg0: i32) -> (i32, i32) {
    %c0_i32 = arith.constant 0 : i32
    %c0_i32_0 = arith.constant 0 : i32
    %c0_i32_1 = arith.constant 0 : i32
    return %c0_i32, %c0_i32_0 : i32, i32
  }
  func.func @transform_5(%arg0: i32) -> (i32, i32) {
    %c0_i32 = arith.constant 0 : i32
    %c0_i32_0 = arith.constant 0 : i32
    %c0_i32_1 = arith.constant 0 : i32
    return %c0_i32, %c0_i32_0 : i32, i32
  }
  func.func @transform_6(%arg0: i32) -> (i32, i32) {
    %c0_i32 = arith.constant 0 : i32
    %c0_i32_0 = arith.constant 0 : i32
    %c0_i32_1 = arith.constant 0 : i32
    return %c0_i32, %c0_i32_0 : i32, i32
  }
  func.func @transform_7(%arg0: i32) -> (i32, i32) {
    %c0_i32 = arith.constant 0 : i32
    %c0_i32_0 = arith.constant 0 : i32
    %c0_i32_1 = arith.constant 0 : i32
    return %c0_i32, %c0_i32_0 : i32, i32
  }
  func.func @transform_8(%arg0: i32) -> (i32, i32) {
    %c0_i32 = arith.constant 0 : i32
    %c0_i32_0 = arith.constant 0 : i32
    %c0_i32_1 = arith.constant 0 : i32
    return %c0_i32, %c0_i32_0 : i32, i32
  }
  func.func @transform_9(%arg0: i32) -> (i32, i32) {
    %c0_i32 = arith.constant 0 : i32
    %c0_i32_0 = arith.constant 0 : i32
    %c0_i32_1 = arith.constant 0 : i32
    return %c0_i32, %c0_i32_0 : i32, i32
  }
  func.func @transform_10(%arg0: i32) -> (i32, i32) {
    %c0_i32 = arith.constant 0 : i32
    %c0_i32_0 = arith.constant 0 : i32
    %c0_i32_1 = arith.constant 0 : i32
    return %c0_i32, %c0_i32_0 : i32, i32
  }
  func.func @transform_11(%arg0: i32) -> (i32, i32) {
    %c0_i32 = arith.constant 0 : i32
    %c0_i32_0 = arith.constant 0 : i32
    return %arg0, %c0_i32 : i32, i32
  }
}

</mosaic_0001>

<bundles_post_ra>
// kernel: tpu_custom_call.1
= control target key start
LH: loop header
LB: loop body
LE: loop exit
PB: predicated region body
PF: predicated region fallthrough
CT: control target
= control target key end

     0   :  { %16 = vsyncpa [#allocation3], 0  ;;  %s2550_s0 = inlined_call_operand.hbm [shape: f32[8,16], index: 0, kind: input, shape index: {}]   ;;  %s2551_s1 = inlined_call_operand.hbm [shape: f32[8,8], index: 1, kind: input, shape index: {}]   ;;  %s2552_s2 = inlined_call_operand.hbm [shape: bf16[16,512], index: 2, kind: input, shape index: {}]   ;;  %s2553_s3 = inlined_call_operand.hbm [shape: bf16[8,512], index: 3, kind: input, shape index: {}]   ;;  %s2554_s4 = inlined_call_operand.hbm [shape: f32[1,512], index: 4, kind: input, shape index: {}]   ;;  %s2555_s5 = inlined_call_operand.hbm [shape: bf16[512,384], index: 5, kind: input, shape index: {}]   ;;  %s2556_s6 = inlined_call_operand.vmem [shape: f32[1,384], index: 6, kind: input, shape index: {}]   ;;  %s2557_s7 = inlined_call_operand.hbm [shape: bf16[384,128], index: 7, kind: input, shape index: {}]   ;;  %s2558_s8 = inlined_call_operand.vmem [shape: f32[1,128], index: 8, kind: input, shape index: {}]   ;;  %s2559_s9 = inlined_call_operand.hbm [shape: bf16[128,128], index: 9, kind: input, shape index: {}]   ;;  %s2560_s10 = inlined_call_operand.vmem [shape: f32[1,128], index: 10, kind: input, shape index: {}]   ;;  %s2561_s11 = inlined_call_operand.hbm [shape: f32[8,128], index: 11, kind: output, shape index: {}]  }
   0x1   :  { %17 = vsyncpa [#allocation6], 0 }
   0x2   :  { %18 = vsyncpa [#allocation9], 0 }
   0x3   :  { %19 = vsyncpa [#allocation12], 0 }
   0x4   :  { %20 = vsyncpa [#allocation15], 0  ;;  %s38_s19 = sshll.u32 %s2551_s1, 4  ;;  %s39_s19 = int_to_ptr.hbm [resolvable:$true] %s38_s19 }
   0x5   :  { %21 = vsyncpa [#allocation4], 0  ;;  %s2407_s20 = smov [#allocation5]   ;;  %s62_s24 = sshll.u32 %s2553_s3, 4  ;;  %s63_s24 = int_to_ptr.hbm [resolvable:$true] %s62_s24 }
   0x6   :  { %s40_s21 = sshll.u32 %s2407_s20, 4  ;;  %s2408_s25 = smov [#allocation8]   ;;  %s41_s21 = int_to_ptr.vmem [resolvable:$true] %s40_s21 }
   0x7   :  { %43 = dma.hbm_to_vmem [thread:$0]  %s39_s19, 128, %s41_s21, [#allocation6]  }
   0x8   :  { %s64_s26 = sshll.u32 %s2408_s25, 4  ;;  %s83_s29 = sshll.u32 %s2555_s5, 4  ;;  %s65_s26 = int_to_ptr.vmem [resolvable:$true] %s64_s26  ;;  %s84_s29 = int_to_ptr.hbm [resolvable:$true] %s83_s29 }
   0x9   :  { %67 = dma.hbm_to_vmem [thread:$0]  %s63_s24, 256, %s65_s26, [#allocation9]  }
   0xa   :  { %s2409_s1 = smov [#allocation11]   ;;  %s27_s14 = sshll.u32 %s2550_s0, 4  ;;  %s28_s14 = int_to_ptr.hbm [resolvable:$true] %s27_s14 }
   0xb   :  { %s85_s30 = sshll.u32 %s2409_s1, 4  ;;  %s2410_s15 = smov 192   ;;  %s86_s30 = int_to_ptr.vmem [resolvable:$true] %s85_s30 }
   0xc   :  { %s2411_s3 = smov 12   ;;  %s2412_s16 = smov [#allocation2]  }
   0xd   :  { %91 = dma.hbm_to_vmem [thread:$0]  %s84_s29, 12288, %s86_s30, [#allocation12], %s2410_s15, %s2410_s15, %s2411_s3  }
   0xe   :  { %s29_s17 = sshll.u32 %s2412_s16, 4  ;;  %s48_s5 = sshll.u32 %s2552_s2, 4  ;;  %s30_s17 = int_to_ptr.vmem [resolvable:$true] %s29_s17  ;;  %s49_s5 = int_to_ptr.hbm [resolvable:$true] %s48_s5 }
   0xf   :  { %32 = dma.hbm_to_vmem [thread:$0]  %s28_s14, 128, %s30_s17, [#allocation3]  }
  0x10   :  { %s2413_s20 = smov [#allocation7]   ;;  %s73_s0 = sshll.u32 %s2554_s4, 4  ;;  %s74_s0 = int_to_ptr.hbm [resolvable:$true] %s73_s0 }
  0x11   :  { %s50_s21 = sshll.u32 %s2413_s20, 4  ;;  %s2414_s24 = smov 256   ;;  %s51_s21 = int_to_ptr.vmem [resolvable:$true] %s50_s21 }
  0x12   :  { %s2415_s25 = smov 16   ;;  %s2416_s26 = smov [#allocation10]  }
  0x13   :  { %56 = dma.hbm_to_vmem [thread:$0]  %s49_s5, 512, %s51_s21, [#allocation6], %s2414_s24, %s2414_s24, %s2415_s25  }
  0x14   :  { %s75_s27 = sshll.u32 %s2416_s26, 4  ;;  %s98_s2 = sshll.u32 %s2557_s7, 4  ;;  %s76_s27 = int_to_ptr.vmem [resolvable:$true] %s75_s27  ;;  %s99_s2 = int_to_ptr.hbm [resolvable:$true] %s98_s2 }
  0x15   :  { %78 = dma.hbm_to_vmem [thread:$0]  %s74_s0, 64, %s76_s27, [#allocation9]  }
  0x16   :  { %s2417_s1 = smov [#allocation13]   ;;  %s113_s4 = sshll.u32 %s2559_s9, 4  ;;  %s114_s4 = int_to_ptr.hbm [resolvable:$true] %s113_s4 }
  0x17   :  { %s100_s30 = sshll.u32 %s2417_s1, 4  ;;  %s2418_s14 = smov 64   ;;  %s101_s30 = int_to_ptr.vmem [resolvable:$true] %s100_s30 }
  0x18   :  { %s2419_s15 = smov 4   ;;  %s2420_s3 = smov [#allocation14]  }
  0x19   :  { %106 = dma.hbm_to_vmem [thread:$0]  %s99_s2, 3072, %s101_s30, [#allocation12], %s2418_s14, %s2418_s14, %s2419_s15  }
  0x1a   :  { %s115_s16 = sshll.u32 %s2420_s3, 4  ;;  %s116_s16 = int_to_ptr.vmem [resolvable:$true] %s115_s16 }
  0x1b   :  { %121 = dma.hbm_to_vmem [thread:$0]  %s114_s4, 1024, %s116_s16, [#allocation15], %s2418_s14, %s2418_s14, %s2419_s15  }
  0x1c   :  { %2395 = dma.done.wait [#allocation3], 128  }
  0x1d   :  { %2396 = vsyncadd [#allocation3], 4294967168 }
  0x1e   :  { %2397 = dma.done.wait [#allocation6], 640  }
  0x1f   :  { %2398 = vsyncadd [#allocation6], 4294966656 }
  0x20   :  { %2399 = dma.done.wait [#allocation9], 320  }
  0x21   :  { %2400 = vsyncadd [#allocation9], 4294966976 }
  0x22   :  { %2401 = dma.done.wait [#allocation12], 15360  }
  0x23   :  { %2402 = vsyncadd [#allocation12], 4294951936 }
  0x24   :  { %2403 = dma.done.wait [#allocation15], 1024  }
  0x25   :  { %2404 = vsyncadd [#allocation15], 4294966272  ;;  %v165_v0 = vld [vmem:[#allocation8] sm:$0xff]  ;;  %v166_v1 = vld [vmem:[#allocation8 + $0x8] sm:$0xff]  ;;  %vm181_vm0 = vcmask 1043456   ;;  %vm177_vm1 = vcmask 64512  }
  0x26   :  { %v159_v2 = vld [vmem:[#allocation5] sm:$0xff]  ;;  %v169_v3 = vunpack.c.l.b16 %v165_v0  ;;  %v170_v4 = vunpack.c.h.b16 %v165_v0  ;;  %v171_v5 = vunpack.c.l.b16 %v166_v1  ;;  %v172_v6 = vunpack.c.h.b16 %v166_v1  ;;  %v1508_v7 = vld [vmem:[#allocation7 + $0x8] sm:$0xf]  ;;  %v2031_v9 = vld [vmem:[#allocation7 + $0xc] sm:$0xf]  ;;  %s2421_s5 = smov [#allocation16]  }
  0x27   :  { %v2033_v8 = vld [vmem:[#allocation7 + $0x14] sm:$0xf0]  ;;  %v1510_v10 = vld [vmem:[#allocation7 + $0x18] sm:$0xf0]  ;;  %v1500_v11 = vld [vmem:[#allocation7] sm:$0xf]  ;;  %v160_v19 = vpack.c.bf16 %v159_v2, %v159_v2 }
  0x28   :  { %v173_v12 = vpack.c.b16 %v169_v3, %v169_v3  ;;  %v174_v13 = vpack.c.b16 %v170_v4, %v170_v4  ;;  %v175_v14 = vpack.c.b16 %v171_v5, %v171_v5  ;;  %v176_v15 = vpack.c.b16 %v172_v6, %v172_v6  ;;  %v2032_v16 = vld [vmem:[#allocation7 + $0xc] sm:$0xf0]  ;;  %v2030_v17 = vld [vmem:[#allocation7 + $0x4] sm:$0xf]  ;;  %v1502_v18 = vld [vmem:[#allocation7 + $0x10] sm:$0xf0] }
  0x29   :  { %v1509_v20 = vor.u32 %v2033_v8, %v1508_v7  ;;  %v1513_v21 = vor.u32 %v2031_v9, %v1510_v10  ;;  %v1604_v22 = vld [vmem:[#allocation11 + $0xa8] sm:$0xf]  ;;  %v2056_v23 = vld [vmem:[#allocation11 + $0xb0] sm:$0xf0]  ;;  %v1501_v30 = vor.u32 %v2032_v16, %v1500_v11  ;;  %v1505_v31 = vor.u32 %v2030_v17, %v1502_v18  ;;  %v1592_v36 = vld [vmem:[#allocation11 + $0x90] sm:$0xf] }
  0x2a   :  { %v1700_v24 = vld [vmem:[#allocation11 + $0x168] sm:$0xf]  ;;  %v183_v25 = vsel %vm181_vm0, %v173_v12, 0  ;;  %v186_v26 = vsel %vm181_vm0, %v174_v13, 0  ;;  %v189_v27 = vsel %vm181_vm0, %v175_v14, 0  ;;  %v192_v28 = vsel %vm181_vm0, %v176_v15, 0 }
  0x2b   :  { %v2080_v29 = vld [vmem:[#allocation11 + $0x170] sm:$0xf0]  ;;  %201 = vmatpush.bf16.msra.mxu0 %v183_v25  ;;  %214 = vmatpush.bf16.msra.mxu1 %v186_v26  ;;  %v1796_v32 = vld [vmem:[#allocation11 + $0x228] sm:$0xf]  ;;  %v1605_v34 = vor.u32 %v2056_v23, %v1604_v22  ;;  %v2053_v39 = vld [vmem:[#allocation11 + $0x98] sm:$0xf0] }
  0x2c   :  { %227 = vmatpush.bf16.msra.mxu2 %v189_v27  ;;  %240 = vmatpush.bf16.msra.mxu3 %v192_v28  ;;  %v2104_v33 = vld [vmem:[#allocation11 + $0x230] sm:$0xf0]  ;;  %v1701_v35 = vor.u32 %v2080_v29, %v1700_v24  ;;  %v1892_v37 = vld [vmem:[#allocation11 + $0x2e8] sm:$0xf]  ;;  %v1688_v40 = vld [vmem:[#allocation11 + $0x150] sm:$0xf]  ;;  %v1593_v48 = vor.u32 %v2053_v39, %v1592_v36 }
  0x2d   :  { %v2128_v38 = vld [vmem:[#allocation11 + $0x2f0] sm:$0xf0]  ;;  %v2077_v41 = vld [vmem:[#allocation11 + $0x158] sm:$0xf0]  ;;  %v1797_v42 = vor.u32 %v2104_v33, %v1796_v32  ;;  %v1784_v44 = vld [vmem:[#allocation11 + $0x210] sm:$0xf] }
  0x2e   :  { %1494 = vmatmul.msk.bf16.vlgmr.msra.gmra.mxu0 %vm177_vm1, %v160_v19  ;;  %1495 = vmatmul.msk.bf16.vlgmr.msra.gmra.mxu1 %vm177_vm1, %v160_v19  ;;  %v1893_v43 = vor.u32 %v2128_v38, %v1892_v37  ;;  %v2101_v45 = vld [vmem:[#allocation11 + $0x218] sm:$0xf0]  ;;  %v1880_v46 = vld [vmem:[#allocation11 + $0x2d0] sm:$0xf]  ;;  %v1689_v49 = vor.u32 %v2077_v41, %v1688_v40  ;;  %v1580_v50 = vld [vmem:[#allocation11 + $0x78] sm:$0xf] }
  0x2f   :  { %1496 = vmatmul.msk.bf16.vlgmr.msra.gmra.mxu2 %vm177_vm1, %v160_v19  ;;  %1497 = vmatmul.msk.bf16.vlgmr.msra.gmra.mxu3 %vm177_vm1, %v160_v19  ;;  %v2125_v47 = vld [vmem:[#allocation11 + $0x2d8] sm:$0xf0]  ;;  %v2050_v51 = vld [vmem:[#allocation11 + $0x80] sm:$0xf0]  ;;  %v1676_v52 = vld [vmem:[#allocation11 + $0x138] sm:$0xf]  ;;  %v1785_v54 = vor.u32 %v2101_v45, %v1784_v44 }
  0x30   :  { %303 = vmatpush.bf16.msrb.mxu2 %v1509_v20  ;;  %316 = vmatpush.bf16.msrb.mxu3 %v1513_v21  ;;  %v2074_v53 = vld [vmem:[#allocation11 + $0x140] sm:$0xf0]  ;;  %v1881_v55 = vor.u32 %v2125_v47, %v1880_v46  ;;  %v1772_v56 = vld [vmem:[#allocation11 + $0x1f8] sm:$0xf]  ;;  %v1581_v60 = vor.u32 %v2050_v51, %v1580_v50  ;;  %v1568_v62 = vld [vmem:[#allocation11 + $0x60] sm:$0xf] }
  0x31   :  { %277 = vmatpush.bf16.msrb.mxu0 %v1501_v30  ;;  %290 = vmatpush.bf16.msrb.mxu1 %v1505_v31  ;;  %v2098_v57 = vld [vmem:[#allocation11 + $0x200] sm:$0xf0]  ;;  %v1868_v58 = vld [vmem:[#allocation11 + $0x2b8] sm:$0xf]  ;;  %v1677_v61 = vor.u32 %v2074_v53, %v1676_v52  ;;  %v2047_v63 = vld [vmem:[#allocation11 + $0x68] sm:$0xf0] }
  0x32   :  { %v2122_v59 = vld [vmem:[#allocation11 + $0x2c0] sm:$0xf0]  ;;  %v1664_v0 = vld [vmem:[#allocation11 + $0x120] sm:$0xf]  ;;  %v2071_v1 = vld [vmem:[#allocation11 + $0x128] sm:$0xf0]  ;;  %v1773_v2 = vor.u32 %v2098_v57, %v1772_v56  ;;  %v1569_v7 = vor.u32 %v2047_v63, %v1568_v62 }
  0x33   :  { %v1869_v3 = vor.u32 %v2122_v59, %v1868_v58  ;;  %v157_v4 = vld [vmem:[#allocation2] sm:$0xff]  ;;  %v1556_v5 = vld [vmem:[#allocation11 + $0x48] sm:$0xf]  ;;  %v1665_v8 = vor.u32 %v2071_v1, %v1664_v0  ;;  %v2095_v9 = vld [vmem:[#allocation11 + $0x1e8] sm:$0xf0]  ;;  %vm266_vm2 = vcmask 130048  }
  0x34   :  { %1018 = vmatpush.bf16.msra.mxu2 %v1797_v42  ;;  %1031 = vmatpush.bf16.msra.mxu3 %v1893_v43  ;;  %v1760_v6 = vld [vmem:[#allocation11 + $0x1e0] sm:$0xf]  ;;  %v2119_v11 = vld [vmem:[#allocation11 + $0x2a8] sm:$0xf0]  ;;  %v158_v12 = vpack.c.bf16 %v157_v4, %v157_v4  ;;  %v2044_v13 = vld [vmem:[#allocation11 + $0x50] sm:$0xf0] }
  0x35   :  { %992 = vmatpush.bf16.msra.mxu0 %v1605_v34  ;;  %1005 = vmatpush.bf16.msra.mxu1 %v1701_v35  ;;  %v1856_v10 = vld [vmem:[#allocation11 + $0x2a0] sm:$0xf]  ;;  %v1652_v14 = vld [vmem:[#allocation11 + $0x108] sm:$0xf]  ;;  %v2068_v15 = vld [vmem:[#allocation11 + $0x110] sm:$0xf0]  ;;  %v1761_v16 = vor.u32 %v2095_v9, %v1760_v6  ;;  %v1557_v20 = vor.u32 %v2044_v13, %v1556_v5 }
  0x36   :  { %v1857_v17 = vor.u32 %v2119_v11, %v1856_v10  ;;  %v1544_v18 = vld [vmem:[#allocation11 + $0x30] sm:$0xf]  ;;  %v1748_v19 = vld [vmem:[#allocation11 + $0x1c8] sm:$0xf]  ;;  %v1653_v21 = vor.u32 %v2068_v15, %v1652_v14  ;;  %v2092_v22 = vld [vmem:[#allocation11 + $0x1d0] sm:$0xf0] }
  0x37   :  { %v1844_v23 = vld [vmem:[#allocation11 + $0x288] sm:$0xf]  ;;  %v2116_v24 = vld [vmem:[#allocation11 + $0x290] sm:$0xf0]  ;;  %v2041_v25 = vld [vmem:[#allocation11 + $0x38] sm:$0xf0]  ;;  %v1749_v28 = vor.u32 %v2092_v22, %v1748_v19 }
  0x38   :  { %1019 = vmatpush.bf16.msra.mxu2 %v1785_v54  ;;  %1032 = vmatpush.bf16.msra.mxu3 %v1881_v55  ;;  %v1640_v26 = vld [vmem:[#allocation11 + $0xf0] sm:$0xf]  ;;  %v2065_v27 = vld [vmem:[#allocation11 + $0xf8] sm:$0xf0]  ;;  %v1845_v29 = vor.u32 %v2116_v24, %v1844_v23  ;;  %v1532_v30 = vld [vmem:[#allocation11 + $0x18] sm:$0xf]  ;;  %v1545_v32 = vor.u32 %v2041_v25, %v1544_v18 }
  0x39   :  { %993 = vmatpush.bf16.msra.mxu0 %v1593_v48  ;;  %1006 = vmatpush.bf16.msra.mxu1 %v1689_v49  ;;  %v1736_v31 = vld [vmem:[#allocation11 + $0x1b0] sm:$0xf]  ;;  %v1641_v33 = vor.u32 %v2065_v27, %v1640_v26  ;;  %v2089_v34 = vld [vmem:[#allocation11 + $0x1b8] sm:$0xf0]  ;;  %v2038_v37 = vld [vmem:[#allocation11 + $0x20] sm:$0xf0] }
  0x3a   :  { %v1832_v35 = vld [vmem:[#allocation11 + $0x270] sm:$0xf]  ;;  %v2113_v36 = vld [vmem:[#allocation11 + $0x278] sm:$0xf0]  ;;  %v1628_v38 = vld [vmem:[#allocation11 + $0xd8] sm:$0xf]  ;;  %v1737_v40 = vor.u32 %v2089_v34, %v1736_v31  ;;  %v1533_v45 = vor.u32 %v2038_v37, %v1532_v30 }
  0x3b   :  { %v2062_v39 = vld [vmem:[#allocation11 + $0xe0] sm:$0xf0]  ;;  %v1833_v41 = vor.u32 %v2113_v36, %v1832_v35  ;;  %v1520_v42 = vld [vmem:[#allocation11] sm:$0xf]  ;;  %v2035_v43 = vld [vmem:[#allocation11 + $0x8] sm:$0xf0] }
  0x3c   :  { %1020 = vmatpush.bf16.msra.mxu2 %v1773_v2  ;;  %1033 = vmatpush.bf16.msra.mxu3 %v1869_v3  ;;  %v1724_v44 = vld [vmem:[#allocation11 + $0x198] sm:$0xf]  ;;  %v1629_v46 = vor.u32 %v2062_v39, %v1628_v38  ;;  %v2086_v47 = vld [vmem:[#allocation11 + $0x1a0] sm:$0xf0]  ;;  %v1616_v50 = vld [vmem:[#allocation11 + $0xc0] sm:$0xf]  ;;  %v1521_v58 = vor.u32 %v2035_v43, %v1520_v42 }
  0x3d   :  { %994 = vmatpush.bf16.msra.mxu0 %v1581_v60  ;;  %1007 = vmatpush.bf16.msra.mxu1 %v1677_v61  ;;  %v1820_v48 = vld [vmem:[#allocation11 + $0x258] sm:$0xf]  ;;  %v2110_v49 = vld [vmem:[#allocation11 + $0x260] sm:$0xf0]  ;;  %v2059_v51 = vld [vmem:[#allocation11 + $0xc8] sm:$0xf0]  ;;  %v1725_v56 = vor.u32 %v2086_v47, %v1724_v44 }
  0x3e   :  { %1514 = vmatmul.msk.bf16.vlgmr.msrb.gmra.mxu0 %vm266_vm2, %v158_v12  ;;  %1515 = vmatmul.msk.bf16.vlgmr.msrb.gmra.mxu1 %vm266_vm2, %v158_v12  ;;  %v2055_v52 = vld [vmem:[#allocation11 + $0xac] sm:$0xf]  ;;  %v1606_v53 = vld [vmem:[#allocation11 + $0xb4] sm:$0xf0]  ;;  %v1821_v57 = vor.u32 %v2110_v49, %v1820_v48  ;;  %v1617_v59 = vor.u32 %v2059_v51, %v1616_v50  ;;  %v2052_v62 = vld [vmem:[#allocation11 + $0x94] sm:$0xf] }
  0x3f   :  { %1516 = vmatmul.msk.bf16.vlgmr.msrb.gmra.mxu2 %vm266_vm2, %v158_v12  ;;  %1517 = vmatmul.msk.bf16.vlgmr.msrb.gmra.mxu3 %vm266_vm2, %v158_v12  ;;  %v2079_v54 = vld [vmem:[#allocation11 + $0x16c] sm:$0xf]  ;;  %v1702_v55 = vld [vmem:[#allocation11 + $0x174] sm:$0xf0]  ;;  %v1609_v60 = vor.u32 %v2055_v52, %v1606_v53  ;;  %v1594_v63 = vld [vmem:[#allocation11 + $0x9c] sm:$0xf0] }
  0x40   :  { %1021 = vmatpush.bf16.msra.mxu2 %v1761_v16  ;;  %1034 = vmatpush.bf16.msra.mxu3 %v1857_v17  ;;  %v1705_v61 = vor.u32 %v2079_v54, %v1702_v55  ;;  %v2076_v0 = vld [vmem:[#allocation11 + $0x154] sm:$0xf]  ;;  %v1597_v1 = vor.u32 %v2052_v62, %v1594_v63  ;;  %v1690_v2 = vld [vmem:[#allocation11 + $0x15c] sm:$0xf0]  ;;  %v2083_v4 = vld [vmem:[#allocation11 + $0x188] sm:$0xf0] }
  0x41   :  { %995 = vmatpush.bf16.msra.mxu0 %v1569_v7  ;;  %1008 = vmatpush.bf16.msra.mxu1 %v1665_v8  ;;  %v1712_v3 = vld [vmem:[#allocation11 + $0x180] sm:$0xf]  ;;  %v1693_v5 = vor.u32 %v2076_v0, %v1690_v2  ;;  %v2107_v8 = vld [vmem:[#allocation11 + $0x248] sm:$0xf0]  ;;  %v1798_v11 = vld [vmem:[#allocation11 + $0x234] sm:$0xf0] }
  0x42   :  { %v1713_v6 = vor.u32 %v2083_v4, %v1712_v3  ;;  %v1808_v7 = vld [vmem:[#allocation11 + $0x240] sm:$0xf]  ;;  %v2103_v9 = vld [vmem:[#allocation11 + $0x22c] sm:$0xf]  ;;  %v1894_v13 = vld [vmem:[#allocation11 + $0x2f4] sm:$0xf0] }
  0x43   :  { %v1809_v10 = vor.u32 %v2107_v8, %v1808_v7  ;;  %v2127_v12 = vld [vmem:[#allocation11 + $0x2ec] sm:$0xf]  ;;  %v1801_v14 = vor.u32 %v2103_v9, %v1798_v11  ;;  %v2049_v16 = vld [vmem:[#allocation11 + $0x7c] sm:$0xf]  ;;  %v1582_v17 = vld [vmem:[#allocation11 + $0x84] sm:$0xf0] }
  0x44   :  { %1022 = vmatpush.bf16.msra.mxu2 %v1749_v28  ;;  %1035 = vmatpush.bf16.msra.mxu3 %v1845_v29  ;;  %v1897_v15 = vor.u32 %v2127_v12, %v1894_v13  ;;  %v2073_v18 = vld [vmem:[#allocation11 + $0x13c] sm:$0xf]  ;;  %v1585_v19 = vor.u32 %v2049_v16, %v1582_v17  ;;  %v2100_v22 = vld [vmem:[#allocation11 + $0x214] sm:$0xf]  ;;  %v1786_v23 = vld [vmem:[#allocation11 + $0x21c] sm:$0xf0] }
  0x45   :  { %996 = vmatpush.bf16.msra.mxu0 %v1557_v20  ;;  %1009 = vmatpush.bf16.msra.mxu1 %v1653_v21  ;;  %v1678_v20 = vld [vmem:[#allocation11 + $0x144] sm:$0xf0]  ;;  %v2124_v24 = vld [vmem:[#allocation11 + $0x2d4] sm:$0xf]  ;;  %v1789_v25 = vor.u32 %v2100_v22, %v1786_v23  ;;  %v1882_v26 = vld [vmem:[#allocation11 + $0x2dc] sm:$0xf0] }
  0x46   :  { %v1681_v21 = vor.u32 %v2073_v18, %v1678_v20  ;;  %v1885_v27 = vor.u32 %v2124_v24, %v1882_v26  ;;  %v2046_v28 = vld [vmem:[#allocation11 + $0x64] sm:$0xf]  ;;  %v1570_v29 = vld [vmem:[#allocation11 + $0x6c] sm:$0xf0]  ;;  %v1774_v34 = vld [vmem:[#allocation11 + $0x204] sm:$0xf0] }
  0x47   :  { %v2070_v30 = vld [vmem:[#allocation11 + $0x124] sm:$0xf]  ;;  %v1573_v31 = vor.u32 %v2046_v28, %v1570_v29  ;;  %v2121_v37 = vld [vmem:[#allocation11 + $0x2bc] sm:$0xf]  ;;  %v1870_v38 = vld [vmem:[#allocation11 + $0x2c4] sm:$0xf0] }
  0x48   :  { %1023 = vmatpush.bf16.msra.mxu2 %v1737_v40  ;;  %1036 = vmatpush.bf16.msra.mxu3 %v1833_v41  ;;  %v2043_v39 = vld [vmem:[#allocation11 + $0x4c] sm:$0xf]  ;;  %v1873_v40 = vor.u32 %v2121_v37, %v1870_v38  ;;  %v1558_v41 = vld [vmem:[#allocation11 + $0x54] sm:$0xf0]  ;;  %v1762_v47 = vld [vmem:[#allocation11 + $0x1ec] sm:$0xf0] }
  0x49   :  { %997 = vmatpush.bf16.msra.mxu0 %v1545_v32  ;;  %1010 = vmatpush.bf16.msra.mxu1 %v1641_v33  ;;  %v1666_v32 = vld [vmem:[#allocation11 + $0x12c] sm:$0xf0]  ;;  %v2097_v33 = vld [vmem:[#allocation11 + $0x1fc] sm:$0xf]  ;;  %v2067_v42 = vld [vmem:[#allocation11 + $0x10c] sm:$0xf]  ;;  %v1561_v44 = vor.u32 %v2043_v39, %v1558_v41 }
  0x4a   :  { %v1669_v35 = vor.u32 %v2070_v30, %v1666_v32  ;;  %v1777_v36 = vor.u32 %v2097_v33, %v1774_v34  ;;  %v1654_v43 = vld [vmem:[#allocation11 + $0x114] sm:$0xf0]  ;;  %v2118_v48 = vld [vmem:[#allocation11 + $0x2a4] sm:$0xf]  ;;  %v1858_v50 = vld [vmem:[#allocation11 + $0x2ac] sm:$0xf0] }
  0x4b   :  { %v1861_v51 = vor.u32 %v2118_v48, %v1858_v50  ;;  %v2040_v52 = vld [vmem:[#allocation11 + $0x34] sm:$0xf]  ;;  %v1546_v53 = vld [vmem:[#allocation11 + $0x3c] sm:$0xf0]  ;;  %v1846_v62 = vld [vmem:[#allocation11 + $0x294] sm:$0xf0] }
  0x4c   :  { %1024 = vmatpush.bf16.msra.mxu2 %v1725_v56  ;;  %1037 = vmatpush.bf16.msra.mxu3 %v1821_v57  ;;  %v2064_v54 = vld [vmem:[#allocation11 + $0xf4] sm:$0xf]  ;;  %v1549_v55 = vor.u32 %v2040_v52, %v1546_v53  ;;  %v1642_v56 = vld [vmem:[#allocation11 + $0xfc] sm:$0xf0]  ;;  %v2037_v0 = vld [vmem:[#allocation11 + $0x1c] sm:$0xf] }
  0x4d   :  { %998 = vmatpush.bf16.msra.mxu0 %v1533_v45  ;;  %1011 = vmatpush.bf16.msra.mxu1 %v1629_v46  ;;  %v1657_v45 = vor.u32 %v2067_v42, %v1654_v43  ;;  %v2094_v46 = vld [vmem:[#allocation11 + $0x1e4] sm:$0xf]  ;;  %v1645_v57 = vor.u32 %v2064_v54, %v1642_v56  ;;  %v2061_v2 = vld [vmem:[#allocation11 + $0xdc] sm:$0xf]  ;;  %v1630_v4 = vld [vmem:[#allocation11 + $0xe4] sm:$0xf0] }
  0x4e   :  { %v1765_v49 = vor.u32 %v2094_v46, %v1762_v47  ;;  %v1738_v7 = vld [vmem:[#allocation11 + $0x1bc] sm:$0xf0]  ;;  %v2112_v8 = vld [vmem:[#allocation11 + $0x274] sm:$0xf]  ;;  %v2034_v12 = vld [vmem:[#allocation11 + $0x4] sm:$0xf] }
  0x4f   :  { %v1522_v13 = vld [vmem:[#allocation11 + $0xc] sm:$0xf0]  ;;  %v2085_v18 = vld [vmem:[#allocation11 + $0x19c] sm:$0xf]  ;;  %v1822_v22 = vld [vmem:[#allocation11 + $0x264] sm:$0xf0] }
  0x50   :  { %1025 = vmatpush.bf16.msra.mxu2 %v1713_v6  ;;  %1038 = vmatpush.bf16.msra.mxu3 %v1809_v10  ;;  %v2088_v6 = vld [vmem:[#allocation11 + $0x1b4] sm:$0xf]  ;;  %v1834_v10 = vld [vmem:[#allocation11 + $0x27c] sm:$0xf0]  ;;  %v1618_v16 = vld [vmem:[#allocation11 + $0xcc] sm:$0xf0] }
  0x51   :  { %999 = vmatpush.bf16.msra.mxu0 %v1521_v58  ;;  %1012 = vmatpush.bf16.msra.mxu1 %v1617_v59  ;;  %v2091_v58 = vld [vmem:[#allocation11 + $0x1cc] sm:$0xf]  ;;  %v1750_v59 = vld [vmem:[#allocation11 + $0x1d4] sm:$0xf0]  ;;  %v1741_v9 = vor.u32 %v2088_v6, %v1738_v7  ;;  %v1837_v11 = vor.u32 %v2112_v8, %v1834_v10  ;;  %v2109_v20 = vld [vmem:[#allocation11 + $0x25c] sm:$0xf] }
  0x52   :  { %v1825_v23 = vor.u32 %v2109_v20, %v1822_v22  ;;  %v2082_v24 = vld [vmem:[#allocation11 + $0x184] sm:$0xf]  ;;  %v1810_v28 = vld [vmem:[#allocation11 + $0x24c] sm:$0xf0]  ;;  %v2057_v48 = vld [vmem:[#allocation11 + $0xb8] sm:$0xf0] }
  0x53   :  { %v2081_v50 = vld [vmem:[#allocation11 + $0x178] sm:$0xf0]  ;;  %v1804_v6 = vld [vmem:[#allocation11 + $0x230] sm:$0xf]  ;;  %v1792_v22 = vld [vmem:[#allocation11 + $0x218] sm:$0xf] }
  0x54   :  { %1070 = vmatpush.bf16.msrb.mxu2 %v1801_v14  ;;  %1083 = vmatpush.bf16.msrb.mxu3 %v1897_v15  ;;  %v2058_v14 = vld [vmem:[#allocation11 + $0xc4] sm:$0xf]  ;;  %v1525_v15 = vor.u32 %v2034_v12, %v1522_v13  ;;  %v2105_v7 = vld [vmem:[#allocation11 + $0x238] sm:$0xf0]  ;;  %v1900_v8 = vld [vmem:[#allocation11 + $0x2f0] sm:$0xf] }
  0x55   :  { %1044 = vmatpush.bf16.msrb.mxu0 %v1609_v60  ;;  %1057 = vmatpush.bf16.msrb.mxu1 %v1705_v61  ;;  %v1753_v60 = vor.u32 %v2091_v58, %v1750_v59  ;;  %v2115_v61 = vld [vmem:[#allocation11 + $0x28c] sm:$0xf]  ;;  %v1621_v17 = vor.u32 %v2058_v14, %v1618_v16  ;;  %v2054_v58 = vld [vmem:[#allocation11 + $0xa0] sm:$0xf0]  ;;  %v2129_v12 = vld [vmem:[#allocation11 + $0x2f8] sm:$0xf0] }
  0x56   :  { %v1849_v63 = vor.u32 %v2115_v61, %v1846_v62  ;;  %v1588_v13 = vld [vmem:[#allocation11 + $0x80] sm:$0xf]  ;;  %v2051_v14 = vld [vmem:[#allocation11 + $0x88] sm:$0xf0]  ;;  %v1901_v20 = vor.u32 %v2129_v12, %v1900_v8  ;;  %v2090_v12 = vld [vmem:[#allocation11 + $0x1c0] sm:$0xf0] }
  0x57   :  { %v2075_v16 = vld [vmem:[#allocation11 + $0x148] sm:$0xf0]  ;;  %s1478_s20 = sshll.u32 %s2421_s5, 4  ;;  %s1480_s23 = sshll.u32 %s2561_s11, 4  ;;  %s1479_s20 = int_to_ptr.vmem [resolvable:$true] %s1478_s20  ;;  %s1481_s23 = int_to_ptr.hbm [resolvable:$true] %s1480_s23 }
  0x58   :  { %1071 = vmatpush.bf16.msrb.mxu2 %v1789_v25  ;;  %1084 = vmatpush.bf16.msrb.mxu3 %v1885_v27  ;;  %v1714_v25 = vld [vmem:[#allocation11 + $0x18c] sm:$0xf0]  ;;  %v2106_v27 = vld [vmem:[#allocation11 + $0x244] sm:$0xf]  ;;  %v2063_v8 = vld [vmem:[#allocation11 + $0xe8] sm:$0xf0] }
  0x59   :  { %1045 = vmatpush.bf16.msrb.mxu0 %v1597_v1  ;;  %1058 = vmatpush.bf16.msrb.mxu1 %v1693_v5  ;;  %v1534_v1 = vld [vmem:[#allocation11 + $0x24] sm:$0xf0]  ;;  %v1633_v5 = vor.u32 %v2061_v2, %v1630_v4  ;;  %v1717_v26 = vor.u32 %v2082_v24, %v1714_v25  ;;  %v1813_v29 = vor.u32 %v2106_v27, %v1810_v28  ;;  %v1888_v27 = vld [vmem:[#allocation11 + $0x2d8] sm:$0xf]  ;;  %v2126_v28 = vld [vmem:[#allocation11 + $0x2e0] sm:$0xf0] }
  0x5a   :  { %v1537_v3 = vor.u32 %v2037_v0, %v1534_v1  ;;  %v2078_v0 = vld [vmem:[#allocation11 + $0x160] sm:$0xf0] }
  0x5c   :  { %1072 = vmatpush.bf16.msrb.mxu2 %v1777_v36  ;;  %1085 = vmatpush.bf16.msrb.mxu3 %v1873_v40  ;;  %v322_v36 = vld [vmem:[#allocation10] sm:$0xf] }
  0x5d   :  { %1046 = vmatpush.bf16.msrb.mxu0 %v1585_v19  ;;  %1059 = vmatpush.bf16.msrb.mxu1 %v1681_v21  ;;  %v1726_v19 = vld [vmem:[#allocation11 + $0x1a4] sm:$0xf0]  ;;  %v324_v39 = vperm.slane %v322_v36, 0  ;;  %v325_v40 = vperm.slane %v322_v36, 1  ;;  %v326_v53 = vperm.slane %v322_v36, 2  ;;  %v327_v54 = vperm.slane %v322_v36, 3 }
  0x5e   :  { %v1729_v21 = vor.u32 %v2085_v18, %v1726_v19  ;;  %v1805_v19 = vor.u32 %v2105_v7, %v1804_v6  ;;  %v1889_v36 = vor.u32 %v2126_v28, %v1888_v27  ;;  %v2039_v6 = vld [vmem:[#allocation11 + $0x28] sm:$0xf0]  ;;  %v1636_v7 = vld [vmem:[#allocation11 + $0xe0] sm:$0xf] }
  0x5f   :  { %v1828_v27 = vld [vmem:[#allocation11 + $0x260] sm:$0xf]  ;;  %v2111_v28 = vld [vmem:[#allocation11 + $0x268] sm:$0xf0] }
  0x60   :  { %1073 = vmatpush.bf16.msrb.mxu2 %v1765_v49  ;;  %1086 = vmatpush.bf16.msrb.mxu3 %v1861_v51  ;;  %v1708_v49 = vld [vmem:[#allocation11 + $0x170] sm:$0xf] }
  0x61   :  { %1047 = vmatpush.bf16.msrb.mxu0 %v1573_v31  ;;  %1060 = vmatpush.bf16.msrb.mxu1 %v1669_v35  ;;  %v1709_v56 = vor.u32 %v2081_v50, %v1708_v49  ;;  %v1768_v49 = vld [vmem:[#allocation11 + $0x1e8] sm:$0xf]  ;;  %v2096_v50 = vld [vmem:[#allocation11 + $0x1f0] sm:$0xf0] }
  0x64   :  { %1074 = vmatpush.bf16.msrb.mxu2 %v1753_v60  ;;  %1087 = vmatpush.bf16.msrb.mxu3 %v1849_v63  ;;  %v1696_v63 = vld [vmem:[#allocation11 + $0x158] sm:$0xf] }
  0x65   :  { %1048 = vmatpush.bf16.msrb.mxu0 %v1561_v44  ;;  %1061 = vmatpush.bf16.msrb.mxu1 %v1657_v45  ;;  %v1612_v45 = vld [vmem:[#allocation11 + $0xb0] sm:$0xf] }
  0x68   :  { %1075 = vmatpush.bf16.msrb.mxu2 %v1741_v9  ;;  %1088 = vmatpush.bf16.msrb.mxu3 %v1837_v11  ;;  %v1697_v11 = vor.u32 %v2078_v0, %v1696_v63  ;;  %v1756_v63 = vld [vmem:[#allocation11 + $0x1d0] sm:$0xf]  ;;  %v2093_v0 = vld [vmem:[#allocation11 + $0x1d8] sm:$0xf0] }
  0x69   :  { %1049 = vmatpush.bf16.msrb.mxu0 %v1549_v55  ;;  %1062 = vmatpush.bf16.msrb.mxu1 %v1645_v57  ;;  %v1613_v55 = vor.u32 %v2057_v48, %v1612_v45  ;;  %v1600_v57 = vld [vmem:[#allocation11 + $0x98] sm:$0xf]  ;;  %v1660_v45 = vld [vmem:[#allocation11 + $0x110] sm:$0xf] }
  0x6c   :  { %1076 = vmatpush.bf16.msrb.mxu2 %v1729_v21  ;;  %1089 = vmatpush.bf16.msrb.mxu3 %v1825_v23  ;;  %v1589_v21 = vor.u32 %v2051_v14, %v1588_v13  ;;  %v2102_v23 = vld [vmem:[#allocation11 + $0x220] sm:$0xf0]  ;;  %v1840_v13 = vld [vmem:[#allocation11 + $0x278] sm:$0xf] }
  0x6d   :  { %1050 = vmatpush.bf16.msrb.mxu0 %v1537_v3  ;;  %1063 = vmatpush.bf16.msrb.mxu1 %v1633_v5  ;;  %v1601_v5 = vor.u32 %v2054_v58, %v1600_v57  ;;  %v1648_v57 = vld [vmem:[#allocation11 + $0xf8] sm:$0xf]  ;;  %v2066_v58 = vld [vmem:[#allocation11 + $0x100] sm:$0xf0] }
  0x6e   :  { %v2114_v14 = vld [vmem:[#allocation11 + $0x280] sm:$0xf0] }
  0x70   :  { %1077 = vmatpush.bf16.msrb.mxu2 %v1717_v26  ;;  %1090 = vmatpush.bf16.msrb.mxu3 %v1813_v29  ;;  %v1576_v29 = vld [vmem:[#allocation11 + $0x68] sm:$0xf] }
  0x71   :  { %1051 = vmatpush.bf16.msrb.mxu0 %v1525_v15  ;;  %1064 = vmatpush.bf16.msrb.mxu1 %v1621_v17  ;;  %v1684_v15 = vld [vmem:[#allocation11 + $0x140] sm:$0xf] }
  0x72   :  { %v1685_v26 = vor.u32 %v2075_v16, %v1684_v15  ;;  %v1637_v16 = vor.u32 %v2063_v8, %v1636_v7 }
  0xab   :  { %v203_v30 = vpop.f32.mrf.mxu0  ;;  %v216_v31 = vpop.f32.mrf.mxu1 }
  0xb2   :  { %v229_v32 = vpop.f32.mrf.mxu2  ;;  %v242_v33 = vpop.f32.mrf.mxu3 }
  0xb3   :  { %v205_v34 = vpop.f32.mrf.mxu0  ;;  %v218_v35 = vpop.f32.mrf.mxu1 }
  0xb4   :  { %v2072_v34 = vld [vmem:[#allocation11 + $0x130] sm:$0xf0]  ;;  %v1793_v35 = vor.u32 %v2102_v23, %v1792_v22  ;;  %v1841_v22 = vor.u32 %v2114_v14, %v1840_v13  ;;  %v1732_v23 = vld [vmem:[#allocation11 + $0x1a0] sm:$0xf] }
  0xba   :  { %v231_v37 = vpop.f32.mrf.mxu2  ;;  %v244_v38 = vpop.f32.mrf.mxu3 }
  0xbb   :  { %v279_v41 = vpop.f32.mrf.mxu0  ;;  %v292_v42 = vpop.f32.mrf.mxu1  ;;  %v1780_v37 = vld [vmem:[#allocation11 + $0x200] sm:$0xf] }
  0xbc   :  { %v280_v43 = vadd.f32 %v279_v41, %v203_v30  ;;  %v293_v44 = vadd.f32 %v292_v42, %v216_v31  ;;  %v1876_v41 = vld [vmem:[#allocation11 + $0x2c0] sm:$0xf]  ;;  %v2123_v42 = vld [vmem:[#allocation11 + $0x2c8] sm:$0xf0] }
  0xbd   :  { %v1877_v48 = vor.u32 %v2123_v42, %v1876_v41  ;;  %v2135_v41 = vld [vmem:[#allocation13 + $0x28] sm:$0xff]  ;;  %v2134_v42 = vld [vmem:[#allocation13 + $0x20] sm:$0xff] }
  0xbe   :  { %v332_v46 = vadd.f32 %v324_v39, %v280_v43  ;;  %v333_v47 = vadd.f32 %v325_v40, %v293_v44  ;;  %v2099_v40 = vld [vmem:[#allocation11 + $0x208] sm:$0xf0]  ;;  %v1564_v43 = vld [vmem:[#allocation11 + $0x50] sm:$0xf]  ;;  %v2045_v44 = vld [vmem:[#allocation11 + $0x58] sm:$0xf0] }
  0xc0   :  { %v336_v51 = vmax.f32 %v332_v46, 0.0  ;;  %v337_v52 = vmax.f32 %v333_v47, 0.0  ;;  %v2069_v46 = vld [vmem:[#allocation11 + $0x118] sm:$0xf0]  ;;  %v1781_v47 = vor.u32 %v2099_v40, %v1780_v37  ;;  %v2108_v37 = vld [vmem:[#allocation11 + $0x250] sm:$0xf0] }
  0xc2   :  { %v2518_v59 = vpack.c.bf16 %v336_v51, %v336_v51  ;;  %v2520_v60 = vpack.c.bf16 %v337_v52, %v337_v52  ;;  %v305_v61 = vpop.f32.mrf.mxu2  ;;  %v318_v62 = vpop.f32.mrf.mxu3  ;;  %v1864_v51 = vld [vmem:[#allocation11 + $0x2a8] sm:$0xf]  ;;  %v2120_v52 = vld [vmem:[#allocation11 + $0x2b0] sm:$0xf0] }
  0xc3   :  { %v306_v1 = vadd.f32 %v305_v61, %v229_v32  ;;  %v319_v2 = vadd.f32 %v318_v62, %v242_v33  ;;  %v281_v3 = vpop.f32.mrf.mxu0  ;;  %v294_v4 = vpop.f32.mrf.mxu1  ;;  %v2048_v32 = vld [vmem:[#allocation11 + $0x70] sm:$0xf0]  ;;  %v1672_v33 = vld [vmem:[#allocation11 + $0x128] sm:$0xf]  ;;  %v1769_v61 = vor.u32 %v2096_v50, %v1768_v49  ;;  %v1865_v62 = vor.u32 %v2120_v52, %v1864_v51 }
  0xc4   :  { %1000 = vmatmul.bf16.vlgmr.msra.gmra.mxu0 %v2518_v59  ;;  %1013 = vmatmul.bf16.vlgmr.msra.gmra.mxu1 %v2520_v60  ;;  %v1577_v38 = vor.u32 %v2048_v32, %v1576_v29  ;;  %v1673_v39 = vor.u32 %v2072_v34, %v1672_v33  ;;  %v1649_v4 = vor.u32 %v2066_v58, %v1648_v57  ;;  %v1720_v34 = vld [vmem:[#allocation11 + $0x188] sm:$0xf]  ;;  %v2140_v49 = vld [vmem:[#allocation13 + $0x50] sm:$0xff]  ;;  %v2150_v57 = vld [vmem:[#allocation13 + $0xa0] sm:$0xff] }
  0xc5   :  { %v334_v9 = vadd.f32 %v326_v53, %v306_v1  ;;  %v335_v10 = vadd.f32 %v327_v54, %v319_v2  ;;  %1096 = vmatpush.bf16.msra.mxu0 %v1613_v55  ;;  %1109 = vmatpush.bf16.msra.mxu1 %v1709_v56  ;;  %v1565_v53 = vor.u32 %v2045_v44, %v1564_v43  ;;  %v1552_v55 = vld [vmem:[#allocation11 + $0x38] sm:$0xf]  ;;  %v2042_v56 = vld [vmem:[#allocation11 + $0x40] sm:$0xf0]  ;;  %v1852_v1 = vld [vmem:[#allocation11 + $0x290] sm:$0xf] }
  0xc6   :  { %v1661_v54 = vor.u32 %v2069_v46, %v1660_v45  ;;  %v2117_v2 = vld [vmem:[#allocation11 + $0x298] sm:$0xf0]  ;;  %v1553_v3 = vor.u32 %v2042_v56, %v1552_v55  ;;  %v1829_v33 = vor.u32 %v2111_v28, %v1828_v27  ;;  %v2132_v45 = vld [vmem:[#allocation13 + $0x10] sm:$0xff]  ;;  %v2139_v51 = vld [vmem:[#allocation13 + $0x48] sm:$0xff] }
  0xc7   :  { %v338_v17 = vmax.f32 %v334_v9, 0.0  ;;  %v339_v18 = vmax.f32 %v335_v10, 0.0  ;;  %v1757_v9 = vor.u32 %v2093_v0, %v1756_v63  ;;  %v1853_v10 = vor.u32 %v2117_v2, %v1852_v1  ;;  %v2133_v43 = vld [vmem:[#allocation13 + $0x18] sm:$0xff]  ;;  %v2144_v46 = vld [vmem:[#allocation13 + $0x70] sm:$0xff]  ;;  %v2151_v52 = vld [vmem:[#allocation13 + $0xa8] sm:$0xff] }
  0xc8   :  { %v2145_v44 = vld [vmem:[#allocation13 + $0x78] sm:$0xff]  ;;  %v2152_v50 = vld [vmem:[#allocation13 + $0xb0] sm:$0xff]  ;;  %v2138_v56 = vld [vmem:[#allocation13 + $0x40] sm:$0xff] }
  0xc9   :  { %v2524_v24 = vpack.c.bf16 %v338_v17, %v338_v17  ;;  %v2526_v25 = vpack.c.bf16 %v339_v18, %v339_v18  ;;  %1097 = vmatpush.bf16.msra.mxu0 %v1601_v5  ;;  %1110 = vmatpush.bf16.msra.mxu1 %v1697_v11  ;;  %v1540_v5 = vld [vmem:[#allocation11 + $0x20] sm:$0xf]  ;;  %v1744_v11 = vld [vmem:[#allocation11 + $0x1b8] sm:$0xf]  ;;  %v1528_v17 = vld [vmem:[#allocation11 + $0x8] sm:$0xf] }
  0xca   :  { %v307_v30 = vpop.f32.mrf.mxu2  ;;  %v320_v31 = vpop.f32.mrf.mxu3  ;;  %v1541_v15 = vor.u32 %v2039_v6, %v1540_v5  ;;  %v2036_v18 = vld [vmem:[#allocation11 + $0x10] sm:$0xf0]  ;;  %v472_v55 = vld [vmem:[%s2556_s6] sm:$0x7]  ;;  %v2147_v5 = vld [vmem:[#allocation13 + $0x88] sm:$0xff] }
  0xcb   :  { %1026 = vmatmul.bf16.vlgmr.msra.gmra.mxu2 %v2524_v24  ;;  %1039 = vmatmul.bf16.vlgmr.msra.gmra.mxu3 %v2526_v25  ;;  %v1529_v29 = vor.u32 %v2036_v18, %v1528_v17  ;;  %v2137_v31 = vld [vmem:[#allocation13 + $0x38] sm:$0xff]  ;;  %v474_v58 = vperm.slane %v472_v55, 0  ;;  %v2148_v1 = vld [vmem:[#allocation13 + $0x90] sm:$0xff]  ;;  %v475_v13 = vperm.slane %v472_v55, 1 }
  0xcc   :  { %1122 = vmatpush.bf16.msra.mxu2 %v1805_v19  ;;  %1135 = vmatpush.bf16.msra.mxu3 %v1901_v20  ;;  %v1624_v19 = vld [vmem:[#allocation11 + $0xc8] sm:$0xf]  ;;  %v2060_v20 = vld [vmem:[#allocation11 + $0xd0] sm:$0xf0] }
  0xcd   :  { %1098 = vmatpush.bf16.msra.mxu0 %v1589_v21  ;;  %1111 = vmatpush.bf16.msra.mxu1 %v1685_v26  ;;  %v1745_v21 = vor.u32 %v2090_v12, %v1744_v11  ;;  %v2087_v26 = vld [vmem:[#allocation11 + $0x1a8] sm:$0xf0]  ;;  %v1625_v30 = vor.u32 %v2060_v20, %v1624_v19 }
  0xce   :  { %v1733_v32 = vor.u32 %v2087_v26, %v1732_v23 }
  0xd0   :  { %1123 = vmatpush.bf16.msra.mxu2 %v1793_v35  ;;  %1136 = vmatpush.bf16.msra.mxu3 %v1889_v36  ;;  %v2084_v35 = vld [vmem:[#allocation11 + $0x190] sm:$0xf0]  ;;  %v1816_v36 = vld [vmem:[#allocation11 + $0x248] sm:$0xf] }
  0xd1   :  { %1099 = vmatpush.bf16.msra.mxu0 %v1577_v38  ;;  %1112 = vmatpush.bf16.msra.mxu1 %v1673_v39  ;;  %v2136_v38 = vld [vmem:[#allocation13 + $0x30] sm:$0xff]  ;;  %v1721_v39 = vor.u32 %v2084_v35, %v1720_v34  ;;  %v1817_v40 = vor.u32 %v2108_v37, %v1816_v36 }
  0xd4   :  { %1124 = vmatpush.bf16.msra.mxu2 %v1781_v47  ;;  %1137 = vmatpush.bf16.msra.mxu3 %v1877_v48  ;;  %v2130_v47 = vld [vmem:[#allocation13] sm:$0xff] }
  0xd5   :  { %1052 = vmatmul.bf16.vlgmr.msrb.gmra.mxu0 %v2518_v59  ;;  %1065 = vmatmul.bf16.vlgmr.msrb.gmra.mxu1 %v2520_v60  ;;  %v2142_v48 = vld [vmem:[#allocation13 + $0x60] sm:$0xff] }
  0xd6   :  { %1100 = vmatpush.bf16.msra.mxu0 %v1565_v53  ;;  %1113 = vmatpush.bf16.msra.mxu1 %v1661_v54 }
  0xd8   :  { %1125 = vmatpush.bf16.msra.mxu2 %v1769_v61  ;;  %1138 = vmatpush.bf16.msra.mxu3 %v1865_v62  ;;  %v2149_v61 = vld [vmem:[#allocation13 + $0x98] sm:$0xff] }
  0xda   :  { %1101 = vmatpush.bf16.msra.mxu0 %v1553_v3  ;;  %1114 = vmatpush.bf16.msra.mxu1 %v1649_v4 }
  0xdb   :  { %1078 = vmatmul.bf16.vlgmr.msrb.gmra.mxu2 %v2524_v24  ;;  %1091 = vmatmul.bf16.vlgmr.msrb.gmra.mxu3 %v2526_v25 }
  0xdc   :  { %1126 = vmatpush.bf16.msra.mxu2 %v1757_v9  ;;  %1139 = vmatpush.bf16.msra.mxu3 %v1853_v10  ;;  %v2146_v10 = vld [vmem:[#allocation13 + $0x80] sm:$0xff] }
  0xde   :  { %1102 = vmatpush.bf16.msra.mxu0 %v1541_v15  ;;  %1115 = vmatpush.bf16.msra.mxu1 %v1637_v16 }
  0xe0   :  { %1127 = vmatpush.bf16.msra.mxu2 %v1745_v21  ;;  %1140 = vmatpush.bf16.msra.mxu3 %v1841_v22 }
  0xe2   :  { %1103 = vmatpush.bf16.msra.mxu0 %v1529_v29  ;;  %1116 = vmatpush.bf16.msra.mxu1 %v1625_v30  ;;  %v476_v30 = vperm.slane %v472_v55, 2 }
  0xe4   :  { %1128 = vmatpush.bf16.msra.mxu2 %v1733_v32  ;;  %1141 = vmatpush.bf16.msra.mxu3 %v1829_v33 }
  0xe5   :  { %1104 = vmatmul.bf16.vlgmr.msra.gmra.mxu0 %v2518_v59  ;;  %1117 = vmatmul.bf16.vlgmr.msra.gmra.mxu1 %v2520_v60  ;;  %v2131_v59 = vld [vmem:[#allocation13 + $0x8] sm:$0xff] }
  0xe6   :  { %1350 = vmatpush.bf16.msrb.mxu0 %v2137_v31  ;;  %1363 = vmatpush.bf16.msrb.mxu1 %v2145_v44  ;;  %v2143_v60 = vld [vmem:[#allocation13 + $0x68] sm:$0xff] }
  0xe8   :  { %1129 = vmatpush.bf16.msra.mxu2 %v1721_v39  ;;  %1142 = vmatpush.bf16.msra.mxu3 %v1817_v40 }
  0xea   :  { %1351 = vmatpush.bf16.msrb.mxu0 %v2136_v38  ;;  %1364 = vmatpush.bf16.msrb.mxu1 %v2144_v46  ;;  %v2160_v46 = vld [vmem:[#allocation14 + $0x30] sm:$0xff] }
  0xeb   :  { %1130 = vmatmul.bf16.vlgmr.msra.gmra.mxu2 %v2524_v24  ;;  %1143 = vmatmul.bf16.vlgmr.msra.gmra.mxu3 %v2526_v25  ;;  %v2141_v24 = vld [vmem:[#allocation13 + $0x58] sm:$0xff] }
  0xec   :  { %v2153_v25 = vld [vmem:[#allocation13 + $0xb8] sm:$0xff] }
  0xed   :  { %1376 = vmatpush.bf16.msrb.mxu2 %v2153_v25  ;;  %v2155_v25 = vld [vmem:[#allocation14 + $0x8] sm:$0xff] }
  0xee   :  { %1352 = vmatpush.bf16.msrb.mxu0 %v2135_v41  ;;  %1365 = vmatpush.bf16.msrb.mxu1 %v2143_v60  ;;  %v2158_v60 = vld [vmem:[#allocation14 + $0x20] sm:$0xff] }
  0xf1   :  { %1377 = vmatpush.bf16.msrb.mxu2 %v2152_v50  ;;  %v2154_v50 = vld [vmem:[#allocation14] sm:$0xff] }
  0xf2   :  { %1353 = vmatpush.bf16.msrb.mxu0 %v2134_v42  ;;  %1366 = vmatpush.bf16.msrb.mxu1 %v2142_v48  ;;  %v2156_v48 = vld [vmem:[#allocation14 + $0x10] sm:$0xff] }
  0xf5   :  { %1378 = vmatpush.bf16.msrb.mxu2 %v2151_v52 }
  0xf6   :  { %1354 = vmatpush.bf16.msrb.mxu0 %v2133_v43  ;;  %1367 = vmatpush.bf16.msrb.mxu1 %v2141_v24 }
  0xf9   :  { %1379 = vmatpush.bf16.msrb.mxu2 %v2150_v57 }
  0xfa   :  { %1355 = vmatpush.bf16.msrb.mxu0 %v2132_v45  ;;  %1368 = vmatpush.bf16.msrb.mxu1 %v2140_v49  ;;  %v2161_v45 = vld [vmem:[#allocation14 + $0x38] sm:$0xff] }
  0xfb   :  { %1459 = vmatpush.bf16.msrb.mxu3 %v2161_v45 }
  0xfd   :  { %1380 = vmatpush.bf16.msrb.mxu2 %v2149_v61 }
  0xfe   :  { %1356 = vmatpush.bf16.msrb.mxu0 %v2131_v59  ;;  %1369 = vmatpush.bf16.msrb.mxu1 %v2139_v51  ;;  %v2159_v59 = vld [vmem:[#allocation14 + $0x28] sm:$0xff] }
  0xff   :  { %1460 = vmatpush.bf16.msrb.mxu3 %v2160_v46 }
 0x101   :  { %1381 = vmatpush.bf16.msrb.mxu2 %v2148_v1 }
 0x102   :  { %1357 = vmatpush.bf16.msrb.mxu0 %v2130_v47  ;;  %1370 = vmatpush.bf16.msrb.mxu1 %v2138_v56  ;;  %v2157_v47 = vld [vmem:[#allocation14 + $0x18] sm:$0xff] }
 0x103   :  { %1461 = vmatpush.bf16.msrb.mxu3 %v2159_v59 }
 0x105   :  { %1382 = vmatpush.bf16.msrb.mxu2 %v2147_v5 }
 0x107   :  { %1462 = vmatpush.bf16.msrb.mxu3 %v2158_v60 }
 0x109   :  { %1383 = vmatpush.bf16.msrb.mxu2 %v2146_v10 }
 0x10b   :  { %1463 = vmatpush.bf16.msrb.mxu3 %v2157_v47 }
 0x10f   :  { %1464 = vmatpush.bf16.msrb.mxu3 %v2156_v48 }
 0x113   :  { %1465 = vmatpush.bf16.msrb.mxu3 %v2155_v25 }
 0x117   :  { %1466 = vmatpush.bf16.msrb.mxu3 %v2154_v50 }
 0x141   :  { %v1001_v53 = vpop.f32.mrf.mxu0  ;;  %v1014_v54 = vpop.f32.mrf.mxu1 }
 0x142   :  { %v1002_v62 = vadd.f32 %v1001_v53, %v474_v58  ;;  %v2177_v53 = vld [vmem:[%s2558_s8] ss:$0 sm:$0xff] }
 0x144   :  { %v1015_v2 = vadd.f32 %v1014_v54, %v1002_v62 }
 0x149   :  { %v1003_v63 = vpop.f32.mrf.mxu0  ;;  %v1016_v0 = vpop.f32.mrf.mxu1 }
 0x14a   :  { %v2178_v63 = vld [vmem:[%s2560_s10] ss:$0 sm:$0xff] }
 0x14e   :  { %v1027_v3 = vpop.f32.mrf.mxu2  ;;  %v1040_v4 = vpop.f32.mrf.mxu3 }
 0x14f   :  { %v1028_v6 = vadd.f32 %v1027_v3, %v1015_v2 }
 0x151   :  { %v1041_v7 = vadd.f32 %v1040_v4, %v1028_v6 }
 0x152   :  { %v1053_v8 = vpop.f32.mrf.mxu0  ;;  %v1066_v9 = vpop.f32.mrf.mxu1 }
 0x153   :  { %v1148_v11 = vmax.f32 %v1041_v7, 0.0  ;;  %v1054_v16 = vadd.f32 %v1053_v8, %v475_v13 }
 0x155   :  { %v1151_v12 = vpack.c.bf16 %v1148_v11, %v1148_v11  ;;  %v1067_v19 = vadd.f32 %v1066_v9, %v1054_v16 }
 0x156   :  { %v1029_v14 = vpop.f32.mrf.mxu2  ;;  %v1042_v15 = vpop.f32.mrf.mxu3 }
 0x157   :  { %1358 = vmatmul.bf16.vlgmr.msrb.gmra.mxu0 %v1151_v12 }
 0x15a   :  { %v1055_v17 = vpop.f32.mrf.mxu0  ;;  %v1068_v18 = vpop.f32.mrf.mxu1 }
 0x15e   :  { %v1079_v20 = vpop.f32.mrf.mxu2  ;;  %v1092_v21 = vpop.f32.mrf.mxu3 }
 0x15f   :  { %v1080_v22 = vadd.f32 %v1079_v20, %v1067_v19 }
 0x161   :  { %v1093_v23 = vadd.f32 %v1092_v21, %v1080_v22 }
 0x162   :  { %v1105_v26 = vpop.f32.mrf.mxu0  ;;  %v1118_v27 = vpop.f32.mrf.mxu1 }
 0x163   :  { %v1149_v28 = vmax.f32 %v1093_v23, 0.0  ;;  %v1106_v33 = vadd.f32 %v1105_v26, %v476_v30 }
 0x165   :  { %v1152_v29 = vpack.c.bf16 %v1149_v28, %v1149_v28  ;;  %v1119_v36 = vadd.f32 %v1118_v27, %v1106_v33 }
 0x166   :  { %v1081_v31 = vpop.f32.mrf.mxu2  ;;  %v1094_v32 = vpop.f32.mrf.mxu3 }
 0x167   :  { %1371 = vmatmul.bf16.vlgmr.msrb.gmra.mxu1 %v1152_v29 }
 0x16a   :  { %v1107_v34 = vpop.f32.mrf.mxu0  ;;  %v1120_v35 = vpop.f32.mrf.mxu1 }
 0x16e   :  { %v1131_v37 = vpop.f32.mrf.mxu2  ;;  %v1144_v38 = vpop.f32.mrf.mxu3 }
 0x16f   :  { %v1132_v39 = vadd.f32 %v1131_v37, %v1119_v36 }
 0x171   :  { %v1145_v40 = vadd.f32 %v1144_v38, %v1132_v39 }
 0x173   :  { %v1150_v41 = vmax.f32 %v1145_v40, 0.0 }
 0x175   :  { %v1153_v42 = vpack.c.bf16 %v1150_v41, %v1150_v41 }
 0x176   :  { %v1133_v43 = vpop.f32.mrf.mxu2  ;;  %v1146_v44 = vpop.f32.mrf.mxu3 }
 0x177   :  { %1384 = vmatmul.bf16.vlgmr.msrb.gmra.mxu2 %v1153_v42 }
 0x1d4   :  { %v1359_v24 = vpop.f32.mrf.mxu0 }
 0x1d5   :  { %v1360_v54 = vadd.f32 %v2177_v53, %v1359_v24 }
 0x1dc   :  { %v1361_v49 = vpop.f32.mrf.mxu0 }
 0x1e4   :  { %v1372_v51 = vpop.f32.mrf.mxu1 }
 0x1e5   :  { %v1373_v55 = vadd.f32 %v1372_v51, %v1360_v54 }
 0x1ec   :  { %v1374_v52 = vpop.f32.mrf.mxu1 }
 0x1fa   :  { %v1385_v56 = vpop.f32.mrf.mxu2 }
 0x1fb   :  { %v1386_v57 = vadd.f32 %v1385_v56, %v1373_v55 }
 0x1fd   :  { %v1389_v58 = vmax.f32 %v1386_v57, 0.0 }
 0x1ff   :  { %v1390_v61 = vpack.c.bf16 %v1389_v58, %v1389_v58 }
 0x201   :  { %1467 = vmatmul.bf16.vlgmr.msrb.gmra.mxu3 %v1390_v61 }
 0x202   :  { %v1387_v62 = vpop.f32.mrf.mxu2 }
 0x284   :  { %v1468_v0 = vpop.f32.mrf.mxu3 }
 0x285   :  { %v1469_v1 = vadd.f32 %v2178_v63, %v1468_v0 }
 0x287   :  { %1472 = vst [vmem:[#allocation16] sm:$0xff] %v1469_v1 }
 0x288   :  { %1483 = dma.vmem_to_hbm [thread:$0]  %s1479_s20, 128, %s1481_s23, [#allocation4]  }
 0x28c   :  { %v1470_v2 = vpop.f32.mrf.mxu3 }
 0x28d   :  { %2405 = dma.done.wait [#allocation4], 128  }
 0x28e   :  { %2406 = vsyncadd [#allocation4], 4294967168 }
 0x28f   :  { %1488 = vsyncpa [#allocation3], 1 }
 0x290   :  { %1489 = vsyncpa [#allocation6], 1 }
 0x291   :  { %1490 = vsyncpa [#allocation9], 1 }
 0x292   :  { %1491 = vsyncpa [#allocation12], 1 }
 0x293   :  { %1492 = vsyncpa [#allocation15], 1 }
 0x294   :  { %1493 = vsyncpa [#allocation4], 1 }

</bundles_post_ra>
